<compile_context>
chip_gen: v5e
topology: v5e:2x2
jax: 0.10.0
libtpu: 0.0.40
codegen_flags: <defaults>
</compile_context>

<pallas_src>
import jax
import jax.numpy as jnp
from jax.experimental import pallas as pl
from jax.experimental.pallas import tpu as pltpu


def _round_up(x, m):
    return ((x + m - 1) // m) * m


# ----------------------------------------------------------------------------
# Kernel
# ----------------------------------------------------------------------------
def _policy_kernel(x_ref, w0_ref, b0_ref, w1_ref, b1_ref, wf_ref, bf_ref, out_ref):
    # Layer 0: Linear(state_dim -> 256) + ReLU   (Dropout = identity in eval)
    h = jnp.dot(x_ref[...], w0_ref[...], preferred_element_type=jnp.float32)
    h = jnp.maximum(h + b0_ref[...], 0.0)

    # Layer 1: Linear(256 -> 128) with BN1 pre-folded into W1/b1, then ReLU
    h = jnp.dot(h.astype(jnp.bfloat16), w1_ref[...], preferred_element_type=jnp.float32)
    h = jnp.maximum(h + b1_ref[...], 0.0)

    # Fused tail: Linear(128 -> 64) + BN2 + Linear(64 -> action_dim), pre-folded
    # host-side into a single K=128 matmul with a lane-dense (padded-to-128) output.
    logits = jnp.dot(h.astype(jnp.bfloat16), wf_ref[...], preferred_element_type=jnp.float32)
    logits = logits + bf_ref[...]

    # Softmax over the padded lane axis; padded columns carry a -1e30 bias so
    # exp() underflows to exactly 0 and they contribute nothing to the denominator.
    m = jnp.max(logits, axis=-1, keepdims=True)
    e = jnp.exp(logits - m)
    inv = pl.reciprocal(jnp.sum(e, axis=-1, keepdims=True), approx=True)
    out_ref[...] = e * inv


# ----------------------------------------------------------------------------
# Wrapper
# ----------------------------------------------------------------------------
def advanced_policy_forward(x, kparams, *, tile_b=1024):
    """x: (B, state_dim) f32 -> (B, action_dim) softmax probabilities (f32)."""
    B, state_dim = x.shape
    w0, b0 = kparams["w0"], kparams["b0"]
    w1, b1 = kparams["w1"], kparams["b1"]
    wf, bf = kparams["wf"], kparams["bf"]
    out_pad = wf.shape[1]
    action_dim = int(kparams["action_dim"])
    h0 = w0.shape[1]
    h1 = w1.shape[1]

    # Batch tiling: clamp tile to the (sublane-rounded) batch; pad so grid is exact.
    tile_b = min(tile_b, _round_up(B, 8))
    b_pad = _round_up(B, tile_b)

    xb = x.astype(jnp.bfloat16)
    if b_pad != B:
        xb = jnp.pad(xb, ((0, b_pad - B), (0, 0)))

    grid = (b_pad // tile_b,)
    const = lambda i: (0, 0)  # weights stay resident across batch tiles

    flops = 2 * b_pad * (state_dim * h0 + h0 * h1 + h1 * out_pad)
    bytes_accessed = (
        xb.size * 2
        + (w0.size + w1.size + wf.size) * 2
        + (b0.size + b1.size + bf.size) * 4
        + b_pad * out_pad * 4
    )

    out = pl.pallas_call(
        _policy_kernel,
        out_shape=jax.ShapeDtypeStruct((b_pad, out_pad), jnp.float32),
        grid=grid,
        in_specs=[
            pl.BlockSpec((tile_b, state_dim), lambda i: (i, 0)),
            pl.BlockSpec(w0.shape, const),
            pl.BlockSpec(b0.shape, const),
            pl.BlockSpec(w1.shape, const),
            pl.BlockSpec(b1.shape, const),
            pl.BlockSpec(wf.shape, const),
            pl.BlockSpec(bf.shape, const),
        ],
        out_specs=pl.BlockSpec((tile_b, out_pad), lambda i: (i, 0)),
        compiler_params=pltpu.CompilerParams(
            dimension_semantics=("parallel",),  # lets v7x shard batch tiles over 2 TCs
        ),
        cost_estimate=pl.CostEstimate(
            flops=flops,
            transcendentals=b_pad * (out_pad + 1),
            bytes_accessed=bytes_accessed,
        ),
    )(xb, w0, b0, w1, b1, wf, bf)

    return out[:B, :action_dim]


# ----------------------------------------------------------------------------
# Parameters (module-faithful raw params + host-side fusion for the kernel)
# ----------------------------------------------------------------------------
def init_raw_params(key, state_dim, action_dim, layer_sizes=(256, 128, 64)):
    """Matches init_weights(): kaiming_normal_(nonlinearity='relu') -> std=sqrt(2/fan_in),
    bias = 0; BatchNorm1d fresh defaults (gamma=1, beta=0, mean=0, var=1).
    Weights stored as (in, out) = transpose of PyTorch's (out, in)."""
    h0, h1, h2 = layer_sizes
    k0, k1, k2, k3 = jax.random.split(key, 4)

    def kaiming(k, fan_in, fan_out):
        std = (2.0 / fan_in) ** 0.5
        return (std * jax.random.normal(k, (fan_in, fan_out))).astype(jnp.float32)

    def bn(n):
        return dict(gamma=jnp.ones((n,), jnp.float32),
                    beta=jnp.zeros((n,), jnp.float32),
                    mean=jnp.zeros((n,), jnp.float32),
                    var=jnp.ones((n,), jnp.float32))

    return dict(
        w0=kaiming(k0, state_dim, h0), b0=jnp.zeros((h0,), jnp.float32),
        w1=kaiming(k1, h0, h1),        b1=jnp.zeros((h1,), jnp.float32), bn1=bn(h1),
        w2=kaiming(k2, h1, h2),        b2=jnp.zeros((h2,), jnp.float32), bn2=bn(h2),
        wo=kaiming(k3, h2, action_dim), bo=jnp.zeros((action_dim,), jnp.float32),
    )


def fuse_params(raw, eps=1e-5, lane=128):
    """Exact host-side folds: BN1 -> W1/b1; (Linear2 + BN2 + Linear_out) -> one matmul.
    Matmul weights cast to bf16; biases kept f32. Output padded to a lane-dense width
    with -1e30 bias on padded columns (softmax-neutral)."""
    def fold(bn):
        s = bn["gamma"] / jnp.sqrt(bn["var"] + eps)
        t = bn["beta"] - bn["mean"] * s
        return s, t

    s1, t1 = fold(raw["bn1"])
    w1f = raw["w1"] * s1[None, :]
    b1f = raw["b1"] * s1 + t1

    s2, t2 = fold(raw["bn2"])
    w2s = raw["w2"] * s2[None, :]
    b2s = raw["b2"] * s2 + t2
    wf = w2s @ raw["wo"]                     # (128, action_dim)
    bf = b2s @ raw["wo"] + raw["bo"]         # (action_dim,)

    action_dim = wf.shape[1]
    out_pad = _round_up(action_dim, lane)
    wf_p = jnp.zeros((wf.shape[0], out_pad), jnp.float32).at[:, :action_dim].set(wf)
    bf_p = jnp.full((out_pad,), -1e30, jnp.float32).at[:action_dim].set(bf)

    return dict(
        w0=raw["w0"].astype(jnp.bfloat16), b0=raw["b0"][None, :],
        w1=w1f.astype(jnp.bfloat16),       b1=b1f[None, :],
        wf=wf_p.astype(jnp.bfloat16),      bf=bf_p[None, :],
        action_dim=action_dim,
    )


def reference_forward(x, raw, eps=1e-5):
    """Pure-JAX f32 reference of the (shape-consistent) forward pass."""
    def bn_apply(h, bn):
        return (h - bn["mean"]) / jnp.sqrt(bn["var"] + eps) * bn["gamma"] + bn["beta"]

    h = jnp.maximum(x @ raw["w0"] + raw["b0"], 0.0)
    h = jnp.maximum(bn_apply(h @ raw["w1"] + raw["b1"], raw["bn1"]), 0.0)
    h = bn_apply(h @ raw["w2"] + raw["b2"], raw["bn2"])
    logits = h @ raw["wo"] + raw["bo"]
    return jax.nn.softmax(logits, axis=-1)


# ----------------------------------------------------------------------------
if __name__ == "__main__":
    state_dim, action_dim, batch = 32, 8, 8

    key = jax.random.PRNGKey(0)
    k_x, k_p = jax.random.split(key)
    x = jax.random.normal(k_x, (batch, state_dim), dtype=jnp.float32)

    raw = init_raw_params(k_p, state_dim, action_dim)
    kparams = fuse_params(raw)

    probs = advanced_policy_forward(x, kparams)
    probs = jax.block_until_ready(probs)

    assert probs.shape == (batch, action_dim)
    assert bool(jnp.all(jnp.isfinite(probs)))
    # softmax rows must sum to ~1 (approx reciprocal tolerance)
    assert bool(jnp.allclose(jnp.sum(probs, axis=-1), 1.0, atol=1e-2))
    # match the pure-JAX f32 reference within bf16-matmul tolerance
    ref = reference_forward(x, raw)
    assert bool(jnp.allclose(probs, ref, atol=3e-2)), float(jnp.max(jnp.abs(probs - ref)))

    print("KERNEL_OK")
</pallas_src>

<mosaic_0001>
module attributes {stable_mosaic.version = 11 : i64} {
  func.func @_policy_kernel(%arg0: i32, %arg1: memref<8x32xbf16, #tpu.memory_space<vmem>>, %arg2: memref<32x256xbf16, #tpu.memory_space<vmem>>, %arg3: memref<1x256xf32, #tpu.memory_space<vmem>>, %arg4: memref<256x128xbf16, #tpu.memory_space<vmem>>, %arg5: memref<1x128xf32, #tpu.memory_space<vmem>>, %arg6: memref<128x128xbf16, #tpu.memory_space<vmem>>, %arg7: memref<1x128xf32, #tpu.memory_space<vmem>>, %arg8: memref<8x128xf32, #tpu.memory_space<vmem>>) attributes {dimension_semantics = [#tpu.dimension_semantics<parallel>], iteration_bounds = array<i64: 1>, scalar_prefetch = 0 : i64, scratch_operands = 0 : i64, tpu.core_type = #tpu.core_type<tc>, window_params = [{transform_indices = @transform_0, window_bounds = array<i64: 8, 32>}, {pipeline_mode = #tpu.pipeline_mode<synchronous>, transform_indices = @transform_1, window_bounds = array<i64: 32, 256>}, {pipeline_mode = #tpu.pipeline_mode<synchronous>, transform_indices = @transform_2, window_bounds = array<i64: 1, 256>}, {pipeline_mode = #tpu.pipeline_mode<synchronous>, transform_indices = @transform_3, window_bounds = array<i64: 256, 128>}, {pipeline_mode = #tpu.pipeline_mode<synchronous>, transform_indices = @transform_4, window_bounds = array<i64: 1, 128>}, {pipeline_mode = #tpu.pipeline_mode<synchronous>, transform_indices = @transform_5, window_bounds = array<i64: 128, 128>}, {pipeline_mode = #tpu.pipeline_mode<synchronous>, transform_indices = @transform_6, window_bounds = array<i64: 1, 128>}, {transform_indices = @transform_7, window_bounds = array<i64: 8, 128>}]} {
    %c0 = arith.constant 0 : index
    %c0_0 = arith.constant 0 : index
    %0 = vector.load %arg1[%c0, %c0_0] : memref<8x32xbf16, #tpu.memory_space<vmem>>, vector<8x32xbf16>
    %c0_1 = arith.constant 0 : index
    %c0_2 = arith.constant 0 : index
    %1 = vector.load %arg2[%c0_1, %c0_2] : memref<32x256xbf16, #tpu.memory_space<vmem>>, vector<32x256xbf16>
    %cst = arith.constant dense<0.000000e+00> : vector<8x256xf32>
    %2 = tpu.matmul %0, %1, %cst {dimension_numbers = #tpu.dot_dimension_numbers<[1], [0], [0], [1], [0, 0, 1, 1], [], []>} : vector<8x32xbf16>, vector<32x256xbf16>, vector<8x256xf32> -> vector<8x256xf32>
    %c0_3 = arith.constant 0 : index
    %c0_4 = arith.constant 0 : index
    %3 = vector.load %arg3[%c0_3, %c0_4] : memref<1x256xf32, #tpu.memory_space<vmem>>, vector<1x256xf32>
    %4 = vector.broadcast %3 : vector<1x256xf32> to vector<8x256xf32>
    %5 = arith.addf %2, %4 : vector<8x256xf32>
    %cst_5 = arith.constant 0.000000e+00 : f32
    %6 = vector.broadcast %cst_5 : f32 to vector<8x256xf32>
    %7 = arith.maximumf %5, %6 : vector<8x256xf32>
    %8 = arith.truncf %7 : vector<8x256xf32> to vector<8x256xbf16>
    %c0_6 = arith.constant 0 : index
    %c0_7 = arith.constant 0 : index
    %9 = vector.load %arg4[%c0_6, %c0_7] : memref<256x128xbf16, #tpu.memory_space<vmem>>, vector<256x128xbf16>
    %cst_8 = arith.constant dense<0.000000e+00> : vector<8x128xf32>
    %10 = tpu.matmul %8, %9, %cst_8 {dimension_numbers = #tpu.dot_dimension_numbers<[1], [0], [0], [1], [0, 0, 1, 1], [], []>} : vector<8x256xbf16>, vector<256x128xbf16>, vector<8x128xf32> -> vector<8x128xf32>
    %c0_9 = arith.constant 0 : index
    %c0_10 = arith.constant 0 : index
    %11 = vector.load %arg5[%c0_9, %c0_10] : memref<1x128xf32, #tpu.memory_space<vmem>>, vector<1x128xf32>
    %12 = vector.broadcast %11 : vector<1x128xf32> to vector<8x128xf32>
    %13 = arith.addf %10, %12 : vector<8x128xf32>
    %cst_11 = arith.constant 0.000000e+00 : f32
    %14 = vector.broadcast %cst_11 : f32 to vector<8x128xf32>
    %15 = arith.maximumf %13, %14 : vector<8x128xf32>
    %16 = arith.truncf %15 : vector<8x128xf32> to vector<8x128xbf16>
    %c0_12 = arith.constant 0 : index
    %c0_13 = arith.constant 0 : index
    %17 = vector.load %arg6[%c0_12, %c0_13] : memref<128x128xbf16, #tpu.memory_space<vmem>>, vector<128x128xbf16>
    %cst_14 = arith.constant dense<0.000000e+00> : vector<8x128xf32>
    %18 = tpu.matmul %16, %17, %cst_14 {dimension_numbers = #tpu.dot_dimension_numbers<[1], [0], [0], [1], [0, 0, 1, 1], [], []>} : vector<8x128xbf16>, vector<128x128xbf16>, vector<8x128xf32> -> vector<8x128xf32>
    %c0_15 = arith.constant 0 : index
    %c0_16 = arith.constant 0 : index
    %19 = vector.load %arg7[%c0_15, %c0_16] : memref<1x128xf32, #tpu.memory_space<vmem>>, vector<1x128xf32>
    %20 = vector.broadcast %19 : vector<1x128xf32> to vector<8x128xf32>
    %21 = arith.addf %18, %20 : vector<8x128xf32>
    %cst_17 = arith.constant dense<0xFF800000> : vector<8xf32>
    %22 = vector.multi_reduction <maximumf>, %21, %cst_17 [1] : vector<8x128xf32> to vector<8xf32>
    %23 = vector.shape_cast %22 : vector<8xf32> to vector<8x1xf32>
    %24 = vector.broadcast %23 : vector<8x1xf32> to vector<8x128xf32>
    %25 = arith.subf %21, %24 : vector<8x128xf32>
    %26 = math.exp %25 : vector<8x128xf32>
    %cst_18 = arith.constant dense<0.000000e+00> : vector<8xf32>
    %27 = vector.multi_reduction <add>, %26, %cst_18 [1] : vector<8x128xf32> to vector<8xf32>
    %28 = vector.shape_cast %27 : vector<8xf32> to vector<8x1xf32>
    %29 = tpu.reciprocal %28 {approx = true} : vector<8x1xf32> -> vector<8x1xf32>
    %30 = vector.broadcast %29 : vector<8x1xf32> to vector<8x128xf32>
    %31 = arith.mulf %26, %30 : vector<8x128xf32>
    %c0_19 = arith.constant 0 : index
    %c0_20 = arith.constant 0 : index
    %32 = vector.load %arg8[%c0_19, %c0_20] : memref<8x128xf32, #tpu.memory_space<vmem>>, vector<8x128xf32>
    tpu.vector_store %arg8[%c0_19, %c0_20], %31 {strides = array<i32>} : memref<8x128xf32, #tpu.memory_space<vmem>>, vector<8x128xf32>,
    return
  }
  func.func @transform_0(%arg0: i32) -> (i32, i32) {
    %c0_i32 = arith.constant 0 : i32
    %c0_i32_0 = arith.constant 0 : i32
    return %arg0, %c0_i32 : i32, i32
  }
  func.func @transform_1(%arg0: i32) -> (i32, i32) {
    %c0_i32 = arith.constant 0 : i32
    %c0_i32_0 = arith.constant 0 : i32
    %c0_i32_1 = arith.constant 0 : i32
    return %c0_i32, %c0_i32_0 : i32, i32
  }
  func.func @transform_2(%arg0: i32) -> (i32, i32) {
    %c0_i32 = arith.constant 0 : i32
    %c0_i32_0 = arith.constant 0 : i32
    %c0_i32_1 = arith.constant 0 : i32
    return %c0_i32, %c0_i32_0 : i32, i32
  }
  func.func @transform_3(%arg0: i32) -> (i32, i32) {
    %c0_i32 = arith.constant 0 : i32
    %c0_i32_0 = arith.constant 0 : i32
    %c0_i32_1 = arith.constant 0 : i32
    return %c0_i32, %c0_i32_0 : i32, i32
  }
  func.func @transform_4(%arg0: i32) -> (i32, i32) {
    %c0_i32 = arith.constant 0 : i32
    %c0_i32_0 = arith.constant 0 : i32
    %c0_i32_1 = arith.constant 0 : i32
    return %c0_i32, %c0_i32_0 : i32, i32
  }
  func.func @transform_5(%arg0: i32) -> (i32, i32) {
    %c0_i32 = arith.constant 0 : i32
    %c0_i32_0 = arith.constant 0 : i32
    %c0_i32_1 = arith.constant 0 : i32
    return %c0_i32, %c0_i32_0 : i32, i32
  }
  func.func @transform_6(%arg0: i32) -> (i32, i32) {
    %c0_i32 = arith.constant 0 : i32
    %c0_i32_0 = arith.constant 0 : i32
    %c0_i32_1 = arith.constant 0 : i32
    return %c0_i32, %c0_i32_0 : i32, i32
  }
  func.func @transform_7(%arg0: i32) -> (i32, i32) {
    %c0_i32 = arith.constant 0 : i32
    %c0_i32_0 = arith.constant 0 : i32
    return %arg0, %c0_i32 : i32, i32
  }
}

</mosaic_0001>

<bundles_post_ra>
// kernel: tpu_custom_call.1
= control target key start
LH: loop header
LB: loop body
LE: loop exit
PB: predicated region body
PF: predicated region fallthrough
CT: control target
= control target key end

     0   :  { %12 = vsyncpa [#allocation3], 0  ;;  %s821_s0 = inlined_call_operand.hbm [shape: bf16[8,32], index: 0, kind: input, shape index: {}]   ;;  %s822_s1 = inlined_call_operand.hbm [shape: bf16[32,256], index: 1, kind: input, shape index: {}]   ;;  %s823_s2 = inlined_call_operand.hbm [shape: f32[1,256], index: 2, kind: input, shape index: {}]   ;;  %s824_s3 = inlined_call_operand.hbm [shape: bf16[256,128], index: 3, kind: input, shape index: {}]   ;;  %s825_s4 = inlined_call_operand.vmem [shape: f32[1,128], index: 4, kind: input, shape index: {}]   ;;  %s826_s5 = inlined_call_operand.hbm [shape: bf16[128,128], index: 5, kind: input, shape index: {}]   ;;  %s827_s6 = inlined_call_operand.vmem [shape: f32[1,128], index: 6, kind: input, shape index: {}]   ;;  %s828_s7 = inlined_call_operand.hbm [shape: f32[8,128], index: 7, kind: output, shape index: {}]  }
   0x1   :  { %13 = vsyncpa [#allocation6], 0 }
   0x2   :  { %14 = vsyncpa [#allocation9], 0  ;;  %s31_s26 = sshll.u32 %s822_s1, 4  ;;  %s32_s26 = int_to_ptr.hbm [resolvable:$true] %s31_s26 }
   0x3   :  { %15 = vsyncpa [#allocation4], 0  ;;  %s747_s27 = smov [#allocation5]   ;;  %s55_s8 = sshll.u32 %s824_s3, 4  ;;  %s56_s8 = int_to_ptr.hbm [resolvable:$true] %s55_s8 }
   0x4   :  { %s33_s28 = sshll.u32 %s747_s27, 4  ;;  %s748_s9 = smov 128   ;;  %s34_s28 = int_to_ptr.vmem [resolvable:$true] %s33_s28 }
   0x5   :  { %s749_s10 = smov 8   ;;  %s750_s11 = smov [#allocation8]  }
   0x6   :  { %39 = dma.hbm_to_vmem [thread:$0]  %s32_s26, 512, %s34_s28, [#allocation6], %s748_s9, %s748_s9, %s749_s10  }
   0x7   :  { %s57_s12 = sshll.u32 %s750_s11, 4  ;;  %s751_s13 = smov 64   ;;  %s58_s12 = int_to_ptr.vmem [resolvable:$true] %s57_s12 }
   0x8   :  { %s752_s14 = smov 4   ;;  %s21_s16 = sshll.u32 %s821_s0, 4  ;;  %s22_s16 = int_to_ptr.hbm [resolvable:$true] %s21_s16 }
   0x9   :  { %63 = dma.hbm_to_vmem [thread:$0]  %s56_s8, 2048, %s58_s12, [#allocation9], %s751_s13, %s751_s13, %s752_s14  }
   0xa   :  { %s753_s17 = smov [#allocation2]   ;;  %s45_s20 = sshll.u32 %s823_s2, 4  ;;  %s46_s20 = int_to_ptr.hbm [resolvable:$true] %s45_s20 }
   0xb   :  { %s23_s18 = sshll.u32 %s753_s17, 4  ;;  %s754_s21 = smov [#allocation7]   ;;  %s24_s18 = int_to_ptr.vmem [resolvable:$true] %s23_s18 }
   0xc   :  { %26 = dma.hbm_to_vmem [thread:$0]  %s22_s16, 64, %s24_s18, [#allocation3]  }
   0xd   :  { %s47_s22 = sshll.u32 %s754_s21, 4  ;;  %s70_s25 = sshll.u32 %s826_s5, 4  ;;  %s48_s22 = int_to_ptr.vmem [resolvable:$true] %s47_s22  ;;  %s71_s25 = int_to_ptr.hbm [resolvable:$true] %s70_s25 }
   0xe   :  { %50 = dma.hbm_to_vmem [thread:$0]  %s46_s20, 32, %s48_s22, [#allocation6]  }
   0xf   :  { %s755_s0 = smov [#allocation10]  }
  0x10   :  { %s72_s26 = sshll.u32 %s755_s0, 4  ;;  %s73_s26 = int_to_ptr.vmem [resolvable:$true] %s72_s26 }
  0x11   :  { %78 = dma.hbm_to_vmem [thread:$0]  %s71_s25, 1024, %s73_s26, [#allocation9], %s751_s13, %s751_s13, %s752_s14  }
  0x12   :  { %739 = dma.done.wait [#allocation3], 64  }
  0x13   :  { %740 = vsyncadd [#allocation3], 4294967232 }
  0x14   :  { %741 = dma.done.wait [#allocation6], 544  }
  0x15   :  { %742 = vsyncadd [#allocation6], 4294966752 }
  0x16   :  { %743 = dma.done.wait [#allocation9], 3072  }
  0x17   :  { %744 = vsyncadd [#allocation9], 4294964224  ;;  %v447_v0 = vld [vmem:[#allocation5 + $0x10] sm:$0xf]  ;;  %v554_v1 = vld [vmem:[#allocation5 + $0x14] sm:$0xf0] }
  0x18   :  { %v439_v2 = vld [vmem:[#allocation5] sm:$0xf]  ;;  %v448_v3 = vor.u32 %v554_v1, %v447_v0  ;;  %v552_v4 = vld [vmem:[#allocation5 + $0x4] sm:$0xf0]  ;;  %v553_v5 = vld [vmem:[#allocation5 + $0x14] sm:$0xf] }
  0x19   :  { %v449_v6 = vld [vmem:[#allocation5 + $0x18] sm:$0xf0]  ;;  %v440_v7 = vor.u32 %v552_v4, %v439_v2  ;;  %v551_v11 = vld [vmem:[#allocation5 + $0x4] sm:$0xf]  ;;  %v441_v12 = vld [vmem:[#allocation5 + $0x8] sm:$0xf0] }
  0x1a   :  { %143 = vmatpush.bf16.msra.mxu1 %v448_v3  ;;  %v562_v8 = vld [vmem:[#allocation8 + $0x38] sm:$0xff]  ;;  %v452_v9 = vor.u32 %v553_v5, %v449_v6  ;;  %v561_v13 = vld [vmem:[#allocation8 + $0x30] sm:$0xff]  ;;  %vm133_vm0 = vcmask 261120   ;;  %v444_v16 = vor.u32 %v551_v11, %v441_v12  ;;  %v560_v17 = vld [vmem:[#allocation8 + $0x28] sm:$0xff]  ;;  %s425_s9 = sshll.u32 %s828_s7, 4  ;;  %s426_s9 = int_to_ptr.hbm [resolvable:$true] %s425_s9 }
  0x1b   :  { %v570_v10 = vld [vmem:[#allocation8 + $0x78] sm:$0xff]  ;;  %299 = vmatpush.bf16.msra.mxu2 %v562_v8  ;;  %v569_v14 = vld [vmem:[#allocation8 + $0x70] sm:$0xff]  ;;  %v559_v18 = vld [vmem:[#allocation8 + $0x20] sm:$0xff] }
  0x1c   :  { %312 = vmatpush.bf16.msra.mxu3 %v570_v10  ;;  %v102_v15 = vld [vmem:[#allocation2] sm:$0xf]  ;;  %v557_v20 = vld [vmem:[#allocation8 + $0x10] sm:$0xff]  ;;  %v556_v21 = vld [vmem:[#allocation8 + $0x8] sm:$0xff] }
  0x1d   :  { %v558_v19 = vld [vmem:[#allocation8 + $0x18] sm:$0xff]  ;;  %v568_v22 = vld [vmem:[#allocation8 + $0x68] sm:$0xff]  ;;  %v555_v23 = vld [vmem:[#allocation8] sm:$0xff] }
  0x1e   :  { %144 = vmatpush.bf16.msra.mxu1 %v440_v7  ;;  %v567_v24 = vld [vmem:[#allocation8 + $0x60] sm:$0xff]  ;;  %v566_v25 = vld [vmem:[#allocation8 + $0x58] sm:$0xff]  ;;  %v565_v26 = vld [vmem:[#allocation8 + $0x50] sm:$0xff] }
  0x1f   :  { %300 = vmatpush.bf16.msra.mxu2 %v561_v13  ;;  %v564_v27 = vld [vmem:[#allocation8 + $0x48] sm:$0xff]  ;;  %v563_v28 = vld [vmem:[#allocation8 + $0x40] sm:$0xff]  ;;  %v578_v29 = vld [vmem:[#allocation10 + $0x38] sm:$0xff] }
  0x20   :  { %313 = vmatpush.bf16.msra.mxu3 %v569_v14  ;;  %v107_v30 = vld [vmem:[#allocation7] sm:$0x3]  ;;  %395 = vmatpush.bf16.msra.mxu0 %v578_v29  ;;  %v577_v31 = vld [vmem:[#allocation10 + $0x30] sm:$0xff]  ;;  %v576_v44 = vld [vmem:[#allocation10 + $0x28] sm:$0xff] }
  0x21   :  { %453 = vmatmul.msk.bf16.vlgmr.msra.gmra.mxu1 %vm133_vm0, %v102_v15  ;;  %v109_v32 = vperm.slane %v107_v30, 0  ;;  %v110_v38 = vperm.slane %v107_v30, 1  ;;  %v575_v45 = vld [vmem:[#allocation10 + $0x20] sm:$0xff]  ;;  %v574_v46 = vld [vmem:[#allocation10 + $0x18] sm:$0xff]  ;;  %v573_v47 = vld [vmem:[#allocation10 + $0x10] sm:$0xff] }
  0x22   :  { %156 = vmatpush.bf16.msrb.mxu1 %v452_v9  ;;  %v572_v48 = vld [vmem:[#allocation10 + $0x8] sm:$0xff]  ;;  %v571_v49 = vld [vmem:[#allocation10] sm:$0xff]  ;;  %v589_v52 = vld [vmem:[%s825_s4] ss:$0 sm:$0xff]  ;;  %s756_s4 = smov [#allocation11]  }
  0x23   :  { %301 = vmatpush.bf16.msra.mxu2 %v560_v17  ;;  %v590_v59 = vld [vmem:[%s827_s6] ss:$0 sm:$0xff]  ;;  %s423_s29 = sshll.u32 %s756_s4, 4  ;;  %s424_s29 = int_to_ptr.vmem [resolvable:$true] %s423_s29 }
  0x24   :  { %314 = vmatpush.bf16.msra.mxu3 %v568_v22  ;;  %396 = vmatpush.bf16.msra.mxu0 %v577_v31 }
  0x26   :  { %157 = vmatpush.bf16.msrb.mxu1 %v444_v16 }
  0x27   :  { %302 = vmatpush.bf16.msra.mxu2 %v559_v18 }
  0x28   :  { %315 = vmatpush.bf16.msra.mxu3 %v567_v24  ;;  %397 = vmatpush.bf16.msra.mxu0 %v576_v44 }
  0x2b   :  { %303 = vmatpush.bf16.msra.mxu2 %v558_v19 }
  0x2c   :  { %316 = vmatpush.bf16.msra.mxu3 %v566_v25  ;;  %398 = vmatpush.bf16.msra.mxu0 %v575_v45 }
  0x2f   :  { %304 = vmatpush.bf16.msra.mxu2 %v557_v20 }
  0x30   :  { %317 = vmatpush.bf16.msra.mxu3 %v565_v26  ;;  %399 = vmatpush.bf16.msra.mxu0 %v574_v46 }
  0x31   :  { %454 = vmatmul.msk.bf16.vlgmr.msrb.gmra.mxu1 %vm133_vm0, %v102_v15 }
  0x33   :  { %305 = vmatpush.bf16.msra.mxu2 %v556_v21 }
  0x34   :  { %318 = vmatpush.bf16.msra.mxu3 %v564_v27  ;;  %400 = vmatpush.bf16.msra.mxu0 %v573_v47 }
  0x37   :  { %306 = vmatpush.bf16.msra.mxu2 %v555_v23 }
  0x38   :  { %319 = vmatpush.bf16.msra.mxu3 %v563_v28  ;;  %401 = vmatpush.bf16.msra.mxu0 %v572_v48 }
  0x3c   :  { %402 = vmatpush.bf16.msra.mxu0 %v571_v49 }
  0x9e   :  { %v146_v33 = vpop.f32.mrf.mxu1 }
  0x9f   :  { %v147_v34 = vadd.f32 %v146_v33, %v109_v32 }
  0xa1   :  { %v163_v35 = vmax.f32 %v147_v34, 0.0 }
  0xa3   :  { %v165_v36 = vpack.c.bf16 %v163_v35, %v163_v35 }
  0xa5   :  { %307 = vmatmul.bf16.vlgmr.msra.gmra.mxu2 %v165_v36 }
  0xa6   :  { %v148_v37 = vpop.f32.mrf.mxu1 }
  0xae   :  { %v159_v39 = vpop.f32.mrf.mxu1 }
  0xaf   :  { %v160_v40 = vadd.f32 %v159_v39, %v110_v38 }
  0xb1   :  { %v164_v41 = vmax.f32 %v160_v40, 0.0 }
  0xb3   :  { %v166_v42 = vpack.c.bf16 %v164_v41, %v164_v41 }
  0xb5   :  { %320 = vmatmul.bf16.vlgmr.msra.gmra.mxu3 %v166_v42 }
  0xb6   :  { %v161_v43 = vpop.f32.mrf.mxu1 }
 0x128   :  { %v308_v50 = vpop.f32.mrf.mxu2 }
 0x129   :  { %v309_v53 = vadd.f32 %v589_v52, %v308_v50 }
 0x130   :  { %v310_v51 = vpop.f32.mrf.mxu2 }
 0x138   :  { %v321_v54 = vpop.f32.mrf.mxu3 }
 0x139   :  { %v322_v55 = vadd.f32 %v321_v54, %v309_v53 }
 0x13b   :  { %v325_v56 = vmax.f32 %v322_v55, 0.0 }
 0x13d   :  { %v326_v57 = vpack.c.bf16 %v325_v56, %v325_v56 }
 0x13f   :  { %403 = vmatmul.bf16.vlgmr.msra.gmra.mxu0 %v326_v57 }
 0x140   :  { %v323_v58 = vpop.f32.mrf.mxu3 }
 0x1bc   :  { %v404_v60 = vpop.f32.mrf.mxu0 }
 0x1bd   :  { %v405_v61 = vadd.f32 %v590_v59, %v404_v60 }
 0x1bf   :  { %408 = vmax.xlane.f32.xlu0 %v405_v61 }
 0x1c4   :  { %v406_v62 = vpop.f32.mrf.mxu0 }
 0x232   :  { %v409_v63 = vpop.xlane.xlu0 %408 }
 0x233   :  { %v410_v0 = vsub.f32 %v405_v61, %v409_v63 }
 0x235   :  { %v411_v1 = vmul.f32 1.442695, %v410_v0 }
 0x237   :  { %591 = vpow2.f32 %v411_v1 }
 0x23d   :  { %v592_v2 = vpop.eup %591 }
 0x23e   :  { %413 = vadd.xlane.f32.xlu0 %v592_v2 }
 0x2b1   :  { %v414_v3 = vpop.xlane.xlu0 %413 }
 0x2b2   :  { %593 = vrcp.f32 %v414_v3 }
 0x2b8   :  { %v594_v4 = vpop.eup %593 }
 0x2b9   :  { %v416_v5 = vmul.f32 %v594_v4, %v592_v2 }
 0x2bb   :  { %417 = vst [vmem:[#allocation11] sm:$0xff] %v416_v5 }
 0x2bc   :  { %428 = dma.vmem_to_hbm [thread:$0]  %s424_s29, 128, %s426_s9, [#allocation4]  }
 0x2bd   :  { %745 = dma.done.wait [#allocation4], 128  }
 0x2be   :  { %746 = vsyncadd [#allocation4], 4294967168 }
 0x2bf   :  { %433 = vsyncpa [#allocation3], 1 }
 0x2c0   :  { %434 = vsyncpa [#allocation6], 1 }
 0x2c1   :  { %435 = vsyncpa [#allocation9], 1 }
 0x2c2   :  { %436 = vsyncpa [#allocation4], 1 }

</bundles_post_ra>
